<compile_context>
chip_gen: v5e
topology: v5e:2x2
jax: 0.10.0
libtpu: 0.0.40
codegen_flags: <defaults>
</compile_context>

<pallas_src>
import functools

import jax
import jax.numpy as jnp
from jax.experimental import pallas as pl
from jax.experimental.pallas import tpu as pltpu


# ------------------------------ fused kernel ------------------------------ #

def _make_fused_kernel(*, ksize, pad, Wp, G, M1, M2, H1, W1):
    """Fused conv1->conv2->conv3 (+BN+ReLU) kernel for one image.

    Activations live on a flattened, zero-guarded padded lattice (Hp*Wp
    columns plus G-wide guards), so every tap of the stride-1 convs is a
    static lane-window read and im2col never leaves VMEM.
    """
    deltas = tuple((i - pad) * Wp + (j - pad)
                   for i in range(ksize) for j in range(ksize))

    def kernel(a1_ref, m0_ref, m1_ref,
               w1_ref, s1_ref, b1_ref,
               w2_ref, s2_ref, b2_ref,
               w3_ref, s3_ref, b3_ref,
               o_ref,
               y1_ref, y2_ref, y3_ref):

        def conv_bn_relu(w_ref, s_ref, b_ref, a, mask):
            # bf16 MXU matmul with f32 accumulation; BN scale + fused
            # (bias - mean)/beta shift applied in the f32 epilogue.
            acc = jnp.dot(w_ref[...], a.astype(jnp.bfloat16),
                          preferred_element_type=jnp.float32)
            y = jnp.maximum(acc * s_ref[...] + b_ref[...], 0.0)
            return y if mask is None else y * mask

        def im2col(src_ref, m_out):
            # In-kernel im2col: ksize*ksize static lane-window reads of the
            # zero-guarded lattice, stacked along the K (sublane) axis.
            return jnp.concatenate(
                [src_ref[:, G + d:G + d + m_out] for d in deltas], axis=0)

        y1_ref[...] = conv_bn_relu(w1_ref, s1_ref, b1_ref,
                                   a1_ref[...], m0_ref[...])
        y2_ref[...] = conv_bn_relu(w2_ref, s2_ref, b2_ref,
                                   im2col(y1_ref, M1), m1_ref[...])
        y3_ref[...] = conv_bn_relu(w3_ref, s3_ref, b3_ref,
                                   im2col(y2_ref, M2), None)

        # Extract the valid (interior) pixels row by row -> dense NCHW tile.
        for h in range(H1):
            src = (h + pad) * Wp + pad
            o_ref[:, h * W1:(h + 1) * W1] = y3_ref[:, src:src + W1]

    return kernel


def _encoder_pallas_call(a1, mask0, mask1, prepped, geom):
    N, K1, M0 = a1.shape
    w1, s1, b1 = prepped["conv1"]
    w2, s2, b2 = prepped["conv2"]
    w3, s3, b3 = prepped["conv3"]
    C1, C2, C3 = w1.shape[0], w2.shape[0], w3.shape[0]
    K2, K3 = w2.shape[1], w3.shape[1]
    M1, M2 = geom["M1"], geom["M2"]
    H1, W1 = geom["H1"], geom["W1"]
    M_out = H1 * W1

    kernel = _make_fused_kernel(
        ksize=geom["ksize"], pad=geom["pad"], Wp=geom["Wp"], G=geom["G"],
        M1=M1, M2=M2, H1=H1, W1=W1)

    flops = 2 * N * (C1 * K1 * M0 + C2 * K2 * M1 + C3 * K3 * M2)
    bytes_accessed = int(
        a1.size * 2 + (mask0.size + mask1.size) * 4
        + (w1.size + w2.size + w3.size) * 2
        + (s1.size + b1.size + s2.size + b2.size + s3.size + b3.size) * 4
        + N * C3 * M_out * 4)

    resident = lambda n: (0, 0)          # weights / masks stay VMEM-resident

    return pl.pallas_call(
        kernel,
        out_shape=jax.ShapeDtypeStruct((N, C3, M_out), jnp.float32),
        grid=(N,),                       # one image per grid step
        in_specs=[
            pl.BlockSpec((None, K1, M0), lambda n: (n, 0, 0)),  # conv1 columns
            pl.BlockSpec((1, M0), resident),                    # interior mask L0
            pl.BlockSpec((1, M1), resident),                    # interior mask L1
            pl.BlockSpec((C1, K1), resident), pl.BlockSpec((C1, 1), resident),
            pl.BlockSpec((C1, 1), resident),
            pl.BlockSpec((C2, K2), resident), pl.BlockSpec((C2, 1), resident),
            pl.BlockSpec((C2, 1), resident),
            pl.BlockSpec((C3, K3), resident), pl.BlockSpec((C3, 1), resident),
            pl.BlockSpec((C3, 1), resident),
        ],
        out_specs=pl.BlockSpec((None, C3, M_out), lambda n: (n, 0, 0)),
        scratch_shapes=[
            pltpu.VMEM((C1, M0), jnp.float32),   # conv1 activations (lattice)
            pltpu.VMEM((C2, M1), jnp.float32),   # conv2 activations (lattice)
            pltpu.VMEM((C3, M2), jnp.float32),   # conv3 activations (lattice)
        ],
        compiler_params=pltpu.CompilerParams(
            dimension_semantics=("parallel",),
            # Explicit budget: per-step use is well under 1 MiB; 32 MiB is
            # valid on v5e/v6e (128 MiB) and within v7x's 64 MiB physical.
            vmem_limit_bytes=32 * 1024 * 1024),
        cost_estimate=pl.CostEstimate(
            flops=flops, transcendentals=0, bytes_accessed=bytes_accessed),
    )(a1, mask0, mask1, w1, s1, b1, w2, s2, b2, w3, s3, b3)


# ------------------------ host-side prep (per call) ------------------------ #

def _conv1_cols_and_masks(x_nchw, ksize, stride):
    """Host-side im2col for the (strided) first conv, laid out directly on the
    zero-guarded padded lattice used by the in-kernel stride-1 convs.
    Reads NCHW directly (no entry transpose)."""
    N, Cin, H, W = x_nchw.shape
    pad = ksize // 2                                  # Conv2D padding=-1
    H1 = (H + 2 * pad - ksize) // stride + 1
    W1 = (W + 2 * pad - ksize) // stride + 1
    Hp, Wp = H1 + 2 * pad, W1 + 2 * pad
    P = Hp * Wp
    G = pad * Wp + pad                                # max |tap shift|
    M0, M1, M2 = P + 4 * G, P + 2 * G, P

    xb = jnp.pad(x_nchw.astype(jnp.bfloat16),
                 ((0, 0), (0, 0), (pad, pad), (pad, pad)))
    taps = [xb[:, :, i:i + stride * H1:stride, j:j + stride * W1:stride]
            for i in range(ksize) for j in range(ksize)]
    a1 = jnp.stack(taps, axis=1).reshape(N, ksize * ksize * Cin, H1, W1)
    a1 = jnp.pad(a1, ((0, 0), (0, 0), (pad, pad), (pad, pad)))  # -> lattice
    a1 = a1.reshape(N, ksize * ksize * Cin, P)
    a1 = jnp.pad(a1, ((0, 0), (0, 0), (2 * G, 2 * G)))          # guards

    interior = jnp.pad(jnp.ones((H1, W1), jnp.float32),
                       ((pad, pad), (pad, pad))).reshape(1, P)
    mask0 = jnp.pad(interior, ((0, 0), (2 * G, 2 * G)))         # (1, M0)
    mask1 = jnp.pad(interior, ((0, 0), (G, G)))                 # (1, M1)

    geom = dict(ksize=ksize, pad=pad, Wp=Wp, G=G,
                M0=M0, M1=M1, M2=M2, H1=H1, W1=W1)
    return a1, mask0, mask1, geom


def prepare_layer(w, b, gamma, beta, mean, var, eps=1e-5):
    """One-time param prep: (Cout, K) bf16 weights (K order = (kh, kw, cin)),
    plus f32 BN scale and fused BN/conv-bias shift for the f32 epilogue."""
    kh, kw, cin, cout = w.shape
    scale = (gamma / jnp.sqrt(var + eps)).reshape(cout, 1)
    shift = beta.reshape(cout, 1) + scale * (b.reshape(cout, 1)
                                             - mean.reshape(cout, 1))
    wT = jnp.transpose(w, (3, 0, 1, 2)).reshape(cout, kh * kw * cin)
    return (wT.astype(jnp.bfloat16),
            scale.astype(jnp.float32),
            shift.astype(jnp.float32))


@functools.partial(jax.jit, static_argnames=("ksize", "stride1"))
def encoder_block(x_nchw, prepped, ksize, stride1):
    """EncoderBlock.forward: conv1 -> conv2 -> conv3, one fused pallas_call.
    Input and output are NCHW; only im2col of the first layer and a free
    reshape happen outside the kernel."""
    a1, mask0, mask1, geom = _conv1_cols_and_masks(x_nchw, ksize, stride1)
    out = _encoder_pallas_call(a1, mask0, mask1, prepped, geom)
    N = x_nchw.shape[0]
    C3 = prepped["conv3"][0].shape[0]
    return out.reshape(N, C3, geom["H1"], geom["W1"])   # already NCHW


# --------------------------- deterministic params -------------------------- #

def init_conv_params(key, cin, cout, k):
    kw_, kb, kg, kbe, km, kv = jax.random.split(key, 6)
    w = 0.1 * jax.random.normal(kw_, (k, k, cin, cout), jnp.float32)
    b = 0.1 * jax.random.normal(kb, (cout,), jnp.float32)
    gamma = 1.0 + 0.1 * jax.random.normal(kg, (cout,), jnp.float32)
    beta = 0.1 * jax.random.normal(kbe, (cout,), jnp.float32)
    mean = 0.1 * jax.random.normal(km, (cout,), jnp.float32)
    var = 0.9 + 0.1 * jnp.abs(jax.random.normal(kv, (cout,), jnp.float32))
    return (w, b, gamma, beta, mean, var)


# -------------------------------- reference -------------------------------- #

def ref_conv_bn_relu(x, w, b, gamma, beta, mean, var, stride, eps=1e-5):
    pad = w.shape[0] // 2
    z = jax.lax.conv_general_dilated(
        x, w, window_strides=(stride, stride),
        padding=[(pad, pad), (pad, pad)],
        dimension_numbers=("NHWC", "HWIO", "NHWC"))
    z = z + b
    z = gamma * (z - mean) / jnp.sqrt(var + eps) + beta
    return jnp.maximum(z, 0.0)


# ----------------------------------- main ----------------------------------- #

if __name__ == "__main__":
    key = jax.random.PRNGKey(0)
    kx, k1, k2, k3 = jax.random.split(key, 4)

    in_ch, out_ch, ksize, stride = 4, 8, 3, 2
    x = jax.random.normal(kx, (2, in_ch, 16, 16), jnp.float32)   # NCHW

    raw = {
        "conv1": init_conv_params(k1, in_ch, out_ch, ksize),
        "conv2": init_conv_params(k2, out_ch, 2 * out_ch, ksize),
        "conv3": init_conv_params(k3, 2 * out_ch, out_ch, ksize),
    }
    prepped = {name: prepare_layer(*p) for name, p in raw.items()}

    y = encoder_block(x, prepped, ksize=ksize, stride1=stride)
    y = jax.block_until_ready(y)

    # Pure-JAX f32 reference (lax conv, NHWC) for the correctness check.
    xh = jnp.transpose(x, (0, 2, 3, 1))
    r = ref_conv_bn_relu(xh, *raw["conv1"], stride=stride)
    r = ref_conv_bn_relu(r, *raw["conv2"], stride=1)
    r = ref_conv_bn_relu(r, *raw["conv3"], stride=1)
    r = jnp.transpose(r, (0, 3, 1, 2))

    assert y.shape == (2, out_ch, 8, 8), y.shape
    max_err = float(jnp.max(jnp.abs(y - r)))
    mean_err = float(jnp.mean(jnp.abs(y - r)))
    # Tolerance accounts for bf16 MXU inputs between layers (BN scale/shift
    # are applied in f32, weights are unscaled bf16).
    assert mean_err < 1.5e-2, f"mean abs err {mean_err}"
    assert jnp.allclose(y, r, atol=3e-2, rtol=3e-2), f"max abs err {max_err}"
    print("KERNEL_OK")
</pallas_src>

<mosaic_0001>
module attributes {stable_mosaic.version = 11 : i64} {
  func.func @kernel(%arg0: i32, %arg1: memref<1x36x144xbf16, #tpu.memory_space<vmem>>, %arg2: memref<1x144xf32, #tpu.memory_space<vmem>>, %arg3: memref<1x122xf32, #tpu.memory_space<vmem>>, %arg4: memref<8x36xbf16, #tpu.memory_space<vmem>>, %arg5: memref<8x1xf32, #tpu.memory_space<vmem>>, %arg6: memref<8x1xf32, #tpu.memory_space<vmem>>, %arg7: memref<16x72xbf16, #tpu.memory_space<vmem>>, %arg8: memref<16x1xf32, #tpu.memory_space<vmem>>, %arg9: memref<16x1xf32, #tpu.memory_space<vmem>>, %arg10: memref<8x144xbf16, #tpu.memory_space<vmem>>, %arg11: memref<8x1xf32, #tpu.memory_space<vmem>>, %arg12: memref<8x1xf32, #tpu.memory_space<vmem>>, %arg13: memref<1x8x64xf32, #tpu.memory_space<vmem>>, %arg14: memref<8x144xf32, #tpu.memory_space<vmem>>, %arg15: memref<16x122xf32, #tpu.memory_space<vmem>>, %arg16: memref<8x100xf32, #tpu.memory_space<vmem>>) attributes {dimension_semantics = [#tpu.dimension_semantics<parallel>], iteration_bounds = array<i64: 2>, scalar_prefetch = 0 : i64, scratch_operands = 3 : i64, tpu.core_type = #tpu.core_type<tc>, window_params = [{transform_indices = @transform_0, window_bounds = array<i64: 1, 36, 144>}, {pipeline_mode = #tpu.pipeline_mode<synchronous>, transform_indices = @transform_1, window_bounds = array<i64: 1, 144>}, {pipeline_mode = #tpu.pipeline_mode<synchronous>, transform_indices = @transform_2, window_bounds = array<i64: 1, 122>}, {pipeline_mode = #tpu.pipeline_mode<synchronous>, transform_indices = @transform_3, window_bounds = array<i64: 8, 36>}, {pipeline_mode = #tpu.pipeline_mode<synchronous>, transform_indices = @transform_4, window_bounds = array<i64: 8, 1>}, {pipeline_mode = #tpu.pipeline_mode<synchronous>, transform_indices = @transform_5, window_bounds = array<i64: 8, 1>}, {pipeline_mode = #tpu.pipeline_mode<synchronous>, transform_indices = @transform_6, window_bounds = array<i64: 16, 72>}, {pipeline_mode = #tpu.pipeline_mode<synchronous>, transform_indices = @transform_7, window_bounds = array<i64: 16, 1>}, {pipeline_mode = #tpu.pipeline_mode<synchronous>, transform_indices = @transform_8, window_bounds = array<i64: 16, 1>}, {pipeline_mode = #tpu.pipeline_mode<synchronous>, transform_indices = @transform_9, window_bounds = array<i64: 8, 144>}, {pipeline_mode = #tpu.pipeline_mode<synchronous>, transform_indices = @transform_10, window_bounds = array<i64: 8, 1>}, {pipeline_mode = #tpu.pipeline_mode<synchronous>, transform_indices = @transform_11, window_bounds = array<i64: 8, 1>}, {transform_indices = @transform_12, window_bounds = array<i64: 1, 8, 64>}]} {
    %c0 = arith.constant 0 : index
    %c0_0 = arith.constant 0 : index
    %c0_1 = arith.constant 0 : index
    %0 = vector.load %arg1[%c0, %c0_0, %c0_1] : memref<1x36x144xbf16, #tpu.memory_space<vmem>>, vector<1x36x144xbf16>
    %1 = vector.shape_cast %0 : vector<1x36x144xbf16> to vector<36x144xbf16>
    %c0_2 = arith.constant 0 : index
    %c0_3 = arith.constant 0 : index
    %2 = vector.load %arg2[%c0_2, %c0_3] : memref<1x144xf32, #tpu.memory_space<vmem>>, vector<1x144xf32>
    %c0_4 = arith.constant 0 : index
    %c0_5 = arith.constant 0 : index
    %3 = vector.load %arg4[%c0_4, %c0_5] : memref<8x36xbf16, #tpu.memory_space<vmem>>, vector<8x36xbf16>
    %cst = arith.constant dense<0.000000e+00> : vector<8x144xf32>
    %4 = tpu.matmul %3, %1, %cst {dimension_numbers = #tpu.dot_dimension_numbers<[1], [0], [0], [1], [0, 0, 1, 1], [], []>} : vector<8x36xbf16>, vector<36x144xbf16>, vector<8x144xf32> -> vector<8x144xf32>
    %c0_6 = arith.constant 0 : index
    %c0_7 = arith.constant 0 : index
    %5 = vector.load %arg5[%c0_6, %c0_7] : memref<8x1xf32, #tpu.memory_space<vmem>>, vector<8x1xf32>
    %6 = vector.broadcast %5 : vector<8x1xf32> to vector<8x144xf32>
    %7 = arith.mulf %4, %6 : vector<8x144xf32>
    %c0_8 = arith.constant 0 : index
    %c0_9 = arith.constant 0 : index
    %8 = vector.load %arg6[%c0_8, %c0_9] : memref<8x1xf32, #tpu.memory_space<vmem>>, vector<8x1xf32>
    %9 = vector.broadcast %8 : vector<8x1xf32> to vector<8x144xf32>
    %10 = arith.addf %7, %9 : vector<8x144xf32>
    %cst_10 = arith.constant 0.000000e+00 : f32
    %11 = vector.broadcast %cst_10 : f32 to vector<8x144xf32>
    %12 = arith.maximumf %10, %11 : vector<8x144xf32>
    %13 = vector.broadcast %2 : vector<1x144xf32> to vector<8x144xf32>
    %14 = arith.mulf %12, %13 : vector<8x144xf32>
    %c0_11 = arith.constant 0 : index
    %c0_12 = arith.constant 0 : index
    %15 = vector.load %arg14[%c0_11, %c0_12] : memref<8x144xf32, #tpu.memory_space<vmem>>, vector<8x144xf32>
    tpu.vector_store %arg14[%c0_11, %c0_12], %14 {strides = array<i32>} : memref<8x144xf32, #tpu.memory_space<vmem>>, vector<8x144xf32>,
    %c0_13 = arith.constant 0 : index
    %c0_14 = arith.constant 0 : index
    %16 = vector.load %arg14[%c0_13, %c0_14] : memref<8x144xf32, #tpu.memory_space<vmem>>, vector<8x122xf32>
    %c0_15 = arith.constant 0 : index
    %c1 = arith.constant 1 : index
    %17 = vector.load %arg14[%c0_15, %c1] : memref<8x144xf32, #tpu.memory_space<vmem>>, vector<8x122xf32>
    %c0_16 = arith.constant 0 : index
    %c2 = arith.constant 2 : index
    %18 = vector.load %arg14[%c0_16, %c2] : memref<8x144xf32, #tpu.memory_space<vmem>>, vector<8x122xf32>
    %c0_17 = arith.constant 0 : index
    %c10 = arith.constant 10 : index
    %19 = vector.load %arg14[%c0_17, %c10] : memref<8x144xf32, #tpu.memory_space<vmem>>, vector<8x122xf32>
    %c0_18 = arith.constant 0 : index
    %c11 = arith.constant 11 : index
    %20 = vector.load %arg14[%c0_18, %c11] : memref<8x144xf32, #tpu.memory_space<vmem>>, vector<8x122xf32>
    %c0_19 = arith.constant 0 : index
    %c12 = arith.constant 12 : index
    %21 = vector.load %arg14[%c0_19, %c12] : memref<8x144xf32, #tpu.memory_space<vmem>>, vector<8x122xf32>
    %c0_20 = arith.constant 0 : index
    %c20 = arith.constant 20 : index
    %22 = vector.load %arg14[%c0_20, %c20] : memref<8x144xf32, #tpu.memory_space<vmem>>, vector<8x122xf32>
    %c0_21 = arith.constant 0 : index
    %c21 = arith.constant 21 : index
    %23 = vector.load %arg14[%c0_21, %c21] : memref<8x144xf32, #tpu.memory_space<vmem>>, vector<8x122xf32>
    %c0_22 = arith.constant 0 : index
    %c22 = arith.constant 22 : index
    %24 = vector.load %arg14[%c0_22, %c22] : memref<8x144xf32, #tpu.memory_space<vmem>>, vector<8x122xf32>
    %25 = tpu.concatenate %16, %17, %18, %19, %20, %21, %22, %23, %24 in 0 : vector<8x122xf32>, vector<8x122xf32>, vector<8x122xf32>, vector<8x122xf32>, vector<8x122xf32>, vector<8x122xf32>, vector<8x122xf32>, vector<8x122xf32>, vector<8x122xf32> -> vector<72x122xf32>
    %c0_23 = arith.constant 0 : index
    %c0_24 = arith.constant 0 : index
    %26 = vector.load %arg3[%c0_23, %c0_24] : memref<1x122xf32, #tpu.memory_space<vmem>>, vector<1x122xf32>
    %c0_25 = arith.constant 0 : index
    %c0_26 = arith.constant 0 : index
    %27 = vector.load %arg7[%c0_25, %c0_26] : memref<16x72xbf16, #tpu.memory_space<vmem>>, vector<16x72xbf16>
    %28 = arith.truncf %25 : vector<72x122xf32> to vector<72x122xbf16>
    %cst_27 = arith.constant dense<0.000000e+00> : vector<16x122xf32>
    %29 = tpu.matmul %27, %28, %cst_27 {dimension_numbers = #tpu.dot_dimension_numbers<[1], [0], [0], [1], [0, 0, 1, 1], [], []>} : vector<16x72xbf16>, vector<72x122xbf16>, vector<16x122xf32> -> vector<16x122xf32>
    %c0_28 = arith.constant 0 : index
    %c0_29 = arith.constant 0 : index
    %30 = vector.load %arg8[%c0_28, %c0_29] : memref<16x1xf32, #tpu.memory_space<vmem>>, vector<16x1xf32>
    %31 = vector.broadcast %30 : vector<16x1xf32> to vector<16x122xf32>
    %32 = arith.mulf %29, %31 : vector<16x122xf32>
    %c0_30 = arith.constant 0 : index
    %c0_31 = arith.constant 0 : index
    %33 = vector.load %arg9[%c0_30, %c0_31] : memref<16x1xf32, #tpu.memory_space<vmem>>, vector<16x1xf32>
    %34 = vector.broadcast %33 : vector<16x1xf32> to vector<16x122xf32>
    %35 = arith.addf %32, %34 : vector<16x122xf32>
    %cst_32 = arith.constant 0.000000e+00 : f32
    %36 = vector.broadcast %cst_32 : f32 to vector<16x122xf32>
    %37 = arith.maximumf %35, %36 : vector<16x122xf32>
    %38 = vector.broadcast %26 : vector<1x122xf32> to vector<16x122xf32>
    %39 = arith.mulf %37, %38 : vector<16x122xf32>
    %c0_33 = arith.constant 0 : index
    %c0_34 = arith.constant 0 : index
    %40 = vector.load %arg15[%c0_33, %c0_34] : memref<16x122xf32, #tpu.memory_space<vmem>>, vector<16x122xf32>
    tpu.vector_store %arg15[%c0_33, %c0_34], %39 {strides = array<i32>} : memref<16x122xf32, #tpu.memory_space<vmem>>, vector<16x122xf32>,
    %c0_35 = arith.constant 0 : index
    %c0_36 = arith.constant 0 : index
    %41 = vector.load %arg15[%c0_35, %c0_36] : memref<16x122xf32, #tpu.memory_space<vmem>>, vector<16x100xf32>
    %c0_37 = arith.constant 0 : index
    %c1_38 = arith.constant 1 : index
    %42 = vector.load %arg15[%c0_37, %c1_38] : memref<16x122xf32, #tpu.memory_space<vmem>>, vector<16x100xf32>
    %c0_39 = arith.constant 0 : index
    %c2_40 = arith.constant 2 : index
    %43 = vector.load %arg15[%c0_39, %c2_40] : memref<16x122xf32, #tpu.memory_space<vmem>>, vector<16x100xf32>
    %c0_41 = arith.constant 0 : index
    %c10_42 = arith.constant 10 : index
    %44 = vector.load %arg15[%c0_41, %c10_42] : memref<16x122xf32, #tpu.memory_space<vmem>>, vector<16x100xf32>
    %c0_43 = arith.constant 0 : index
    %c11_44 = arith.constant 11 : index
    %45 = vector.load %arg15[%c0_43, %c11_44] : memref<16x122xf32, #tpu.memory_space<vmem>>, vector<16x100xf32>
    %c0_45 = arith.constant 0 : index
    %c12_46 = arith.constant 12 : index
    %46 = vector.load %arg15[%c0_45, %c12_46] : memref<16x122xf32, #tpu.memory_space<vmem>>, vector<16x100xf32>
    %c0_47 = arith.constant 0 : index
    %c20_48 = arith.constant 20 : index
    %47 = vector.load %arg15[%c0_47, %c20_48] : memref<16x122xf32, #tpu.memory_space<vmem>>, vector<16x100xf32>
    %c0_49 = arith.constant 0 : index
    %c21_50 = arith.constant 21 : index
    %48 = vector.load %arg15[%c0_49, %c21_50] : memref<16x122xf32, #tpu.memory_space<vmem>>, vector<16x100xf32>
    %c0_51 = arith.constant 0 : index
    %c22_52 = arith.constant 22 : index
    %49 = vector.load %arg15[%c0_51, %c22_52] : memref<16x122xf32, #tpu.memory_space<vmem>>, vector<16x100xf32>
    %50 = tpu.concatenate %41, %42, %43, %44, %45, %46, %47, %48, %49 in 0 : vector<16x100xf32>, vector<16x100xf32>, vector<16x100xf32>, vector<16x100xf32>, vector<16x100xf32>, vector<16x100xf32>, vector<16x100xf32>, vector<16x100xf32>, vector<16x100xf32> -> vector<144x100xf32>
    %c0_53 = arith.constant 0 : index
    %c0_54 = arith.constant 0 : index
    %51 = vector.load %arg10[%c0_53, %c0_54] : memref<8x144xbf16, #tpu.memory_space<vmem>>, vector<8x144xbf16>
    %52 = arith.truncf %50 : vector<144x100xf32> to vector<144x100xbf16>
    %cst_55 = arith.constant dense<0.000000e+00> : vector<8x100xf32>
    %53 = tpu.matmul %51, %52, %cst_55 {dimension_numbers = #tpu.dot_dimension_numbers<[1], [0], [0], [1], [0, 0, 1, 1], [], []>} : vector<8x144xbf16>, vector<144x100xbf16>, vector<8x100xf32> -> vector<8x100xf32>
    %c0_56 = arith.constant 0 : index
    %c0_57 = arith.constant 0 : index
    %54 = vector.load %arg11[%c0_56, %c0_57] : memref<8x1xf32, #tpu.memory_space<vmem>>, vector<8x1xf32>
    %55 = vector.broadcast %54 : vector<8x1xf32> to vector<8x100xf32>
    %56 = arith.mulf %53, %55 : vector<8x100xf32>
    %c0_58 = arith.constant 0 : index
    %c0_59 = arith.constant 0 : index
    %57 = vector.load %arg12[%c0_58, %c0_59] : memref<8x1xf32, #tpu.memory_space<vmem>>, vector<8x1xf32>
    %58 = vector.broadcast %57 : vector<8x1xf32> to vector<8x100xf32>
    %59 = arith.addf %56, %58 : vector<8x100xf32>
    %cst_60 = arith.constant 0.000000e+00 : f32
    %60 = vector.broadcast %cst_60 : f32 to vector<8x100xf32>
    %61 = arith.maximumf %59, %60 : vector<8x100xf32>
    %c0_61 = arith.constant 0 : index
    %c0_62 = arith.constant 0 : index
    %62 = vector.load %arg16[%c0_61, %c0_62] : memref<8x100xf32, #tpu.memory_space<vmem>>, vector<8x100xf32>
    tpu.vector_store %arg16[%c0_61, %c0_62], %61 {strides = array<i32>} : memref<8x100xf32, #tpu.memory_space<vmem>>, vector<8x100xf32>,
    %c0_63 = arith.constant 0 : index
    %c11_64 = arith.constant 11 : index
    %63 = vector.load %arg16[%c0_63, %c11_64] : memref<8x100xf32, #tpu.memory_space<vmem>>, vector<8x8xf32>
    %c0_65 = arith.constant 0 : index
    %c0_66 = arith.constant 0 : index
    %c0_67 = arith.constant 0 : index
    %64 = vector.load %arg13[%c0_65, %c0_66, %c0_67] : memref<1x8x64xf32, #tpu.memory_space<vmem>>, vector<1x8x8xf32>
    %65 = vector.shape_cast %64 : vector<1x8x8xf32> to vector<8x8xf32>
    %66 = vector.shape_cast %63 : vector<8x8xf32> to vector<1x8x8xf32>
    tpu.vector_store %arg13[%c0_65, %c0_66, %c0_67], %66 {strides = array<i32>} : memref<1x8x64xf32, #tpu.memory_space<vmem>>, vector<1x8x8xf32>,
    %c0_68 = arith.constant 0 : index
    %c21_69 = arith.constant 21 : index
    %67 = vector.load %arg16[%c0_68, %c21_69] : memref<8x100xf32, #tpu.memory_space<vmem>>, vector<8x8xf32>
    %c0_70 = arith.constant 0 : index
    %c0_71 = arith.constant 0 : index
    %c8 = arith.constant 8 : index
    %68 = vector.load %arg13[%c0_70, %c0_71, %c8] : memref<1x8x64xf32, #tpu.memory_space<vmem>>, vector<1x8x8xf32>
    %69 = vector.shape_cast %68 : vector<1x8x8xf32> to vector<8x8xf32>
    %70 = vector.shape_cast %67 : vector<8x8xf32> to vector<1x8x8xf32>
    tpu.vector_store %arg13[%c0_70, %c0_71, %c8], %70 {strides = array<i32>} : memref<1x8x64xf32, #tpu.memory_space<vmem>>, vector<1x8x8xf32>,
    %c0_72 = arith.constant 0 : index
    %c31 = arith.constant 31 : index
    %71 = vector.load %arg16[%c0_72, %c31] : memref<8x100xf32, #tpu.memory_space<vmem>>, vector<8x8xf32>
    %c0_73 = arith.constant 0 : index
    %c0_74 = arith.constant 0 : index
    %c16 = arith.constant 16 : index
    %72 = vector.load %arg13[%c0_73, %c0_74, %c16] : memref<1x8x64xf32, #tpu.memory_space<vmem>>, vector<1x8x8xf32>
    %73 = vector.shape_cast %72 : vector<1x8x8xf32> to vector<8x8xf32>
    %74 = vector.shape_cast %71 : vector<8x8xf32> to vector<1x8x8xf32>
    tpu.vector_store %arg13[%c0_73, %c0_74, %c16], %74 {strides = array<i32>} : memref<1x8x64xf32, #tpu.memory_space<vmem>>, vector<1x8x8xf32>,
    %c0_75 = arith.constant 0 : index
    %c41 = arith.constant 41 : index
    %75 = vector.load %arg16[%c0_75, %c41] : memref<8x100xf32, #tpu.memory_space<vmem>>, vector<8x8xf32>
    %c0_76 = arith.constant 0 : index
    %c0_77 = arith.constant 0 : index
    %c24 = arith.constant 24 : index
    %76 = vector.load %arg13[%c0_76, %c0_77, %c24] : memref<1x8x64xf32, #tpu.memory_space<vmem>>, vector<1x8x8xf32>
    %77 = vector.shape_cast %76 : vector<1x8x8xf32> to vector<8x8xf32>
    %78 = vector.shape_cast %75 : vector<8x8xf32> to vector<1x8x8xf32>
    tpu.vector_store %arg13[%c0_76, %c0_77, %c24], %78 {strides = array<i32>} : memref<1x8x64xf32, #tpu.memory_space<vmem>>, vector<1x8x8xf32>,
    %c0_78 = arith.constant 0 : index
    %c51 = arith.constant 51 : index
    %79 = vector.load %arg16[%c0_78, %c51] : memref<8x100xf32, #tpu.memory_space<vmem>>, vector<8x8xf32>
    %c0_79 = arith.constant 0 : index
    %c0_80 = arith.constant 0 : index
    %c32 = arith.constant 32 : index
    %80 = vector.load %arg13[%c0_79, %c0_80, %c32] : memref<1x8x64xf32, #tpu.memory_space<vmem>>, vector<1x8x8xf32>
    %81 = vector.shape_cast %80 : vector<1x8x8xf32> to vector<8x8xf32>
    %82 = vector.shape_cast %79 : vector<8x8xf32> to vector<1x8x8xf32>
    tpu.vector_store %arg13[%c0_79, %c0_80, %c32], %82 {strides = array<i32>} : memref<1x8x64xf32, #tpu.memory_space<vmem>>, vector<1x8x8xf32>,
    %c0_81 = arith.constant 0 : index
    %c61 = arith.constant 61 : index
    %83 = vector.load %arg16[%c0_81, %c61] : memref<8x100xf32, #tpu.memory_space<vmem>>, vector<8x8xf32>
    %c0_82 = arith.constant 0 : index
    %c0_83 = arith.constant 0 : index
    %c40 = arith.constant 40 : index
    %84 = vector.load %arg13[%c0_82, %c0_83, %c40] : memref<1x8x64xf32, #tpu.memory_space<vmem>>, vector<1x8x8xf32>
    %85 = vector.shape_cast %84 : vector<1x8x8xf32> to vector<8x8xf32>
    %86 = vector.shape_cast %83 : vector<8x8xf32> to vector<1x8x8xf32>
    tpu.vector_store %arg13[%c0_82, %c0_83, %c40], %86 {strides = array<i32>} : memref<1x8x64xf32, #tpu.memory_space<vmem>>, vector<1x8x8xf32>,
    %c0_84 = arith.constant 0 : index
    %c71 = arith.constant 71 : index
    %87 = vector.load %arg16[%c0_84, %c71] : memref<8x100xf32, #tpu.memory_space<vmem>>, vector<8x8xf32>
    %c0_85 = arith.constant 0 : index
    %c0_86 = arith.constant 0 : index
    %c48 = arith.constant 48 : index
    %88 = vector.load %arg13[%c0_85, %c0_86, %c48] : memref<1x8x64xf32, #tpu.memory_space<vmem>>, vector<1x8x8xf32>
    %89 = vector.shape_cast %88 : vector<1x8x8xf32> to vector<8x8xf32>
    %90 = vector.shape_cast %87 : vector<8x8xf32> to vector<1x8x8xf32>
    tpu.vector_store %arg13[%c0_85, %c0_86, %c48], %90 {strides = array<i32>} : memref<1x8x64xf32, #tpu.memory_space<vmem>>, vector<1x8x8xf32>,
    %c0_87 = arith.constant 0 : index
    %c81 = arith.constant 81 : index
    %91 = vector.load %arg16[%c0_87, %c81] : memref<8x100xf32, #tpu.memory_space<vmem>>, vector<8x8xf32>
    %c0_88 = arith.constant 0 : index
    %c0_89 = arith.constant 0 : index
    %c56 = arith.constant 56 : index
    %92 = vector.load %arg13[%c0_88, %c0_89, %c56] : memref<1x8x64xf32, #tpu.memory_space<vmem>>, vector<1x8x8xf32>
    %93 = vector.shape_cast %92 : vector<1x8x8xf32> to vector<8x8xf32>
    %94 = vector.shape_cast %91 : vector<8x8xf32> to vector<1x8x8xf32>
    tpu.vector_store %arg13[%c0_88, %c0_89, %c56], %94 {strides = array<i32>} : memref<1x8x64xf32, #tpu.memory_space<vmem>>, vector<1x8x8xf32>,
    return
  }
  func.func @transform_0(%arg0: i32) -> (i32, i32, i32) {
    %c0_i32 = arith.constant 0 : i32
    %c0_i32_0 = arith.constant 0 : i32
    %c0_i32_1 = arith.constant 0 : i32
    return %arg0, %c0_i32, %c0_i32_0 : i32, i32, i32
  }
  func.func @transform_1(%arg0: i32) -> (i32, i32) {
    %c0_i32 = arith.constant 0 : i32
    %c0_i32_0 = arith.constant 0 : i32
    %c0_i32_1 = arith.constant 0 : i32
    return %c0_i32, %c0_i32_0 : i32, i32
  }
  func.func @transform_2(%arg0: i32) -> (i32, i32) {
    %c0_i32 = arith.constant 0 : i32
    %c0_i32_0 = arith.constant 0 : i32
    %c0_i32_1 = arith.constant 0 : i32
    return %c0_i32, %c0_i32_0 : i32, i32
  }
  func.func @transform_3(%arg0: i32) -> (i32, i32) {
    %c0_i32 = arith.constant 0 : i32
    %c0_i32_0 = arith.constant 0 : i32
    %c0_i32_1 = arith.constant 0 : i32
    return %c0_i32, %c0_i32_0 : i32, i32
  }
  func.func @transform_4(%arg0: i32) -> (i32, i32) {
    %c0_i32 = arith.constant 0 : i32
    %c0_i32_0 = arith.constant 0 : i32
    %c0_i32_1 = arith.constant 0 : i32
    return %c0_i32, %c0_i32_0 : i32, i32
  }
  func.func @transform_5(%arg0: i32) -> (i32, i32) {
    %c0_i32 = arith.constant 0 : i32
    %c0_i32_0 = arith.constant 0 : i32
    %c0_i32_1 = arith.constant 0 : i32
    return %c0_i32, %c0_i32_0 : i32, i32
  }
  func.func @transform_6(%arg0: i32) -> (i32, i32) {
    %c0_i32 = arith.constant 0 : i32
    %c0_i32_0 = arith.constant 0 : i32
    %c0_i32_1 = arith.constant 0 : i32
    return %c0_i32, %c0_i32_0 : i32, i32
  }
  func.func @transform_7(%arg0: i32) -> (i32, i32) {
    %c0_i32 = arith.constant 0 : i32
    %c0_i32_0 = arith.constant 0 : i32
    %c0_i32_1 = arith.constant 0 : i32
    return %c0_i32, %c0_i32_0 : i32, i32
  }
  func.func @transform_8(%arg0: i32) -> (i32, i32) {
    %c0_i32 = arith.constant 0 : i32
    %c0_i32_0 = arith.constant 0 : i32
    %c0_i32_1 = arith.constant 0 : i32
    return %c0_i32, %c0_i32_0 : i32, i32
  }
  func.func @transform_9(%arg0: i32) -> (i32, i32) {
    %c0_i32 = arith.constant 0 : i32
    %c0_i32_0 = arith.constant 0 : i32
    %c0_i32_1 = arith.constant 0 : i32
    return %c0_i32, %c0_i32_0 : i32, i32
  }
  func.func @transform_10(%arg0: i32) -> (i32, i32) {
    %c0_i32 = arith.constant 0 : i32
    %c0_i32_0 = arith.constant 0 : i32
    %c0_i32_1 = arith.constant 0 : i32
    return %c0_i32, %c0_i32_0 : i32, i32
  }
  func.func @transform_11(%arg0: i32) -> (i32, i32) {
    %c0_i32 = arith.constant 0 : i32
    %c0_i32_0 = arith.constant 0 : i32
    %c0_i32_1 = arith.constant 0 : i32
    return %c0_i32, %c0_i32_0 : i32, i32
  }
  func.func @transform_12(%arg0: i32) -> (i32, i32, i32) {
    %c0_i32 = arith.constant 0 : i32
    %c0_i32_0 = arith.constant 0 : i32
    %c0_i32_1 = arith.constant 0 : i32
    return %arg0, %c0_i32, %c0_i32_0 : i32, i32, i32
  }
}

</mosaic_0001>

<bundles_post_ra>
// kernel: encoder_block.1
= control target key start
LH: loop header
LB: loop body
LE: loop exit
PB: predicated region body
PF: predicated region fallthrough
CT: control target
= control target key end

     0   :  { %s1082_s21 = smov 0   ;;  %s1168_s0 = inlined_call_operand.vmem [shape: bf16[2,36,144], index: 0, kind: input, shape index: {}]   ;;  %s1169_s1 = inlined_call_operand.vmem [shape: f32[1,144], index: 1, kind: input, shape index: {}]   ;;  %s1170_s2 = inlined_call_operand.vmem [shape: f32[1,122], index: 2, kind: input, shape index: {}]   ;;  %s1171_s3 = inlined_call_operand.vmem [shape: bf16[8,36], index: 3, kind: input, shape index: {}]   ;;  %s1172_s4 = inlined_call_operand.vmem [shape: f32[8,1], index: 4, kind: input, shape index: {}]   ;;  %s1173_s5 = inlined_call_operand.vmem [shape: f32[8,1], index: 5, kind: input, shape index: {}]   ;;  %s1174_s6 = inlined_call_operand.vmem [shape: bf16[16,72], index: 6, kind: input, shape index: {}]   ;;  %s1175_s7 = inlined_call_operand.vmem [shape: f32[16,1], index: 7, kind: input, shape index: {}]   ;;  %s1176_s8 = inlined_call_operand.vmem [shape: f32[16,1], index: 8, kind: input, shape index: {}]   ;;  %s1177_s9 = inlined_call_operand.vmem [shape: bf16[8,144], index: 9, kind: input, shape index: {}]   ;;  %s1178_s10 = inlined_call_operand.vmem [shape: f32[8,1], index: 10, kind: input, shape index: {}]   ;;  %s1179_s11 = inlined_call_operand.vmem [shape: f32[8,1], index: 11, kind: input, shape index: {}]   ;;  %s1180_s12 = inlined_call_operand.vmem [shape: f32[2,8,64], index: 12, kind: output, shape index: {}]  }
   0x1 LB: > { %s858_s22 = sadd.s32 4294967295, %s1000_s21   ;;  %p862_p0 = scmp.ge.s32.totalorder %s1000_s21, 1  ;;  %s1000_s21 = sphi %s1082_s21, %s22_s21  }
   0x2   : > { %p362_p1 = scmp.lt.s32.totalorder %s1000_s21, 3 }
   0x4   : > { %p363_p2 = pnand %p862_p0, %p362_p1 }
   0x5   : > { %p403_p3 = scmp.lt.s32.totalorder (!%p363_p2), %s858_s22, 1  ;;  %s1003_s17 = smov (!%p363_p2), 116  }
   0x6   : > { %366 = sbr.rel (%p363_p2) target bundleno = 907 (0x38b), region = 68  ;;  %s1004_s18 = smov (!%p363_p2), 107  }
   0x7   : > { %s1005_s19 = smov (!%p363_p2), 106   ;;  %s1006_s20 = smov (!%p363_p2), 127  }
   0x8   : > { %s1007_s23 = smov (!%p363_p2), 117   ;;  %s1008_s24 = smov (!%p363_p2), 108  }
   0x9   : > { %s1009_s27 = smov (!%p363_p2), 126   ;;  %s1013_s15 = smov (!%p363_p2), 109  }
   0xa   : > { %s1014_s16 = smov (!%p363_p2), 111   ;;  %s1016_s26 = smov (!%p363_p2), 105  }
   0xb   : > { %v482_v0 = vld [vmem:[%s1172_s4] sm:$0xff]  ;;  %v1002_v1 = vmov 0   ;;  %s1182_s22 = smov (!%p403_p3, %s858_s22), 1  ;;  %vm449_vm0 = vcmask 1041408   ;;  %vm445_vm1 = vcmask 293888   ;;  %vm508_vm2 = vcmask 130048  }
   0xc   : > { %920 = vset.pattern.permute.xlu0 %v1002_v1  ;;  %951 = vset.pattern.permute.xlu1 %v1002_v1  ;;  %s896_s25 = smul.u32 40, %s1182_s22  ;;  %v490_v3 = vld [vmem:[%s1173_s5] sm:$0xff]  ;;  %v598_v44 = vld [vmem:[%s1175_s7 + $0x8] sm:$0xff]  ;;  %vm559_vm3 = vcmask 867328   ;;  %vm579_vm4 = vcmask 1043456   ;;  %vm545_vm5 = vcmask 883712  }
   0xd   : > { %485 = vperm.xlu0 %920, %v482_v0   ;;  %952 = vset.pattern.permute.xlu2 %v1002_v1  ;;  %v419_v22 = vld [vmem:[%s1171_s3] sm:$0xf]  ;;  %v612_v50 = vld [vmem:[%s1176_s8 + $0x8] sm:$0xff]  ;;  %vm552_vm6 = vcmask 875520   ;;  %vm538_vm7 = vcmask 949248   ;;  %vm531_vm8 = vcmask 957440  }
   0xe   : > { %s407_s28 = scalar_lea.vmem %s1168_s0, %s896_s25  ;;  %v418_v24 = vld [vmem:[%s1169_s1] sm:$0x3]  ;;  %vm524_vm9 = vcmask 965632   ;;  %vm575_vm10 = vcmask 588800   ;;  %vm632_vm11 = vcmask 998400   ;;  %vm747_vm12 = vcmask 818176  }
   0xf   : > { %v417_v2 = vld [vmem:[%s407_s28 + $0x20] sm:$0x33]  ;;  %v875_v6 = vld [vmem:[%s407_s28 + $0x10] sm:$0xf]  ;;  %v894_v9 = vld [vmem:[%s407_s28 + $0x14] sm:$0xf0] }
  0x10   : > { %v433_v4 = vunpack.c.l.b16 %v417_v2  ;;  %v434_v5 = vunpack.c.h.b16 %v417_v2  ;;  %v893_v10 = vld [vmem:[%s407_s28 + $0x14] sm:$0xf]  ;;  %v877_v11 = vld [vmem:[%s407_s28 + $0x18] sm:$0xf0]  ;;  %v876_v14 = vor.u32 %v894_v9, %v875_v6  ;;  %v867_v16 = vld [vmem:[%s407_s28] sm:$0xf] }
  0x11   : > { %v880_v15 = vor.u32 %v893_v10, %v877_v11  ;;  %v892_v17 = vld [vmem:[%s407_s28 + $0x4] sm:$0xf0]  ;;  %v891_v18 = vld [vmem:[%s407_s28 + $0x4] sm:$0xf]  ;;  %v869_v19 = vld [vmem:[%s407_s28 + $0x8] sm:$0xf0] }
  0x12   : > { %v439_v7 = vpack.c.b16 %v433_v4, %v433_v4  ;;  %v440_v8 = vpack.c.b16 %v434_v5, %v434_v5  ;;  %v868_v20 = vor.u32 %v892_v17, %v867_v16  ;;  %v872_v21 = vor.u32 %v891_v18, %v869_v19  ;;  %v611_v42 = vld [vmem:[%s1176_s8] sm:$0xff]  ;;  %s1010_s28 = smov 118   ;;  %s1015_s25 = smov 103  }
  0x13   : > { %v501_v31 = vperm.slane %v418_v24, 0  ;;  %v502_v33 = vperm.slane %v418_v24, 1  ;;  %v597_v43 = vld [vmem:[%s1175_s7] sm:$0xff]  ;;  %s864_s29 = sshll.u32 %s1182_s22, 3  ;;  %vm754_vm13 = vcmask 64512   ;;  %vm761_vm14 = vcmask 130112  }
  0x14   : > { %v451_v12 = vsel %vm449_vm0, %v439_v7, 0  ;;  %v454_v13 = vsel %vm449_vm0, %v440_v8, 0  ;;  %s411_s14 = scalar_lea.vmem %s1180_s12, %s864_s29  ;;  %vm768_vm15 = vcmask 195712   ;;  %vm775_vm0 = vcmask 261312  }
  0x15   : > { %493 = vperm.xlu0 %920, %v490_v3   ;;  %461 = vmatpush.bf16.msra.mxu0 %v451_v12 }
  0x16   : > { %474 = vmatpush.bf16.msra.mxu1 %v454_v13 }
  0x19   : > { %462 = vmatpush.bf16.msra.mxu0 %v876_v14  ;;  %v895_v14 = vld [vmem:[%s1174_s6] sm:$0xff] }
  0x1a   : > { %475 = vmatpush.bf16.msra.mxu1 %v880_v15 }
  0x1d   : > { %463 = vmatpush.bf16.msra.mxu0 %v868_v20  ;;  %v993_v20 = vld [vmem:[%s1170_s2] ss:$0 sm:$0xff] }
  0x1e   : > { %476 = vmatpush.bf16.msra.mxu1 %v872_v21 }
  0x20   : > { %881 = vmatmul.msk.bf16.vlgmr.msra.gmra.mxu0 %vm445_vm1, %v419_v22 }
  0x21   : > { %882 = vmatmul.msk.bf16.vlgmr.msra.gmra.mxu1 %vm445_vm1, %v419_v22  ;;  %vm782_vm1 = vcmask 326912  }
  0x7f   : > { %v486_v23 = vpop.permute.xlu0 %485 }
  0x87   : > { %v494_v29 = vpop.permute.xlu0 %493 }
  0x9d   : > { %v465_v25 = vpop.f32.mrf.mxu0 }
  0x9e   : > { %v478_v26 = vpop.f32.mrf.mxu1  ;;  %v488_v27 = vmul.f32 %v486_v23, %v465_v25 }
  0x9f   : > { %v489_v28 = vmul.f32 %v486_v23, %v478_v26 }
  0xa0   : > { %v496_v30 = vadd.f32 %v494_v29, %v488_v27 }
  0xa1   : > { %v497_v32 = vadd.f32 %v494_v29, %v489_v28 }
  0xa2   : > { %v498_v34 = vmax.f32 %v496_v30, 0.0 }
  0xa3   : > { %v499_v35 = vmax.f32 %v497_v32, 0.0 }
  0xa4   : > { %v1108_v36 = vmul.f32 %v501_v31, %v498_v34  ;;  %v732_v34 = vld [vmem:[%s1178_s10] sm:$0xff] }
  0xa5   : > { %v506_v37 = vmul.f32 %v502_v33, %v499_v35  ;;  %v467_v38 = vpop.f32.mrf.mxu0  ;;  %v739_v35 = vld [vmem:[%s1179_s11] sm:$0xff] }
  0xa6   : > { %v480_v39 = vpop.f32.mrf.mxu1 }
  0xa7   : > { %509 = vst.msk [vmem:[#allocation2 + $0x8] sm:$0xff] %vm508_vm2, %v506_v37 }
  0xae   : > { %v511_v40 = vld [vmem:[#allocation2 + $0x8] sm:$0xff] }
  0xaf   : > { %v941_v41 = vpack.i.bf16 %v511_v40, %v1108_v36 }
  0xb1   : > { %942 = vrot.lane.b32.xlu0 %v941_v41, %s1003_s17  ;;  %932 = vrot.lane.b32.xlu2 %v941_v41, %s1004_s18 }
  0xb2   : > { %922 = vrot.lane.b32.xlu1 %v941_v41, %s1005_s19 }
  0xb9   : > { %513 = vrot.lane.b32.xlu0 %v1108_v36, %s1006_s20  ;;  %937 = vrot.lane.b32.xlu2 %v941_v41, %s1007_s23 }
  0xba   : > { %927 = vrot.lane.b32.xlu1 %v941_v41, %s1008_s24 }
  0xc1   : > { %615 = vperm.xlu0 %920, %v611_v42   ;;  %516 = vrot.lane.b32.xlu2 %v1108_v36, %s1009_s27 }
  0xc2   : > { %947 = vrot.lane.b32.xlu1 %v941_v41, %s1010_s28 }
  0xc9   : > { %606 = vperm.xlu2 %952, %v598_v44  }
  0xca   : > { %601 = vperm.xlu1 %951, %v597_v43  }
  0xd2   : > { %620 = vperm.xlu1 %951, %v612_v50  }
 0x10b   : > { %v933_v45 = vpop.permute.xlu2 %932 }
 0x10c   : > { %v935_v54 = vunpack.i.h.bf16 %v933_v45  ;;  %v934_v55 = vunpack.i.l.bf16 %v933_v45 }
 0x10e   : > { %v553_v1 = vsel %vm552_vm6, %v934_v55, %v935_v54 }
 0x113   : > { %v938_v56 = vpop.permute.xlu2 %937 }
 0x114   : > { %v940_v62 = vunpack.i.h.bf16 %v938_v56  ;;  %v939_v63 = vunpack.i.l.bf16 %v938_v56  ;;  %v687_v56 = vld [vmem:[%s1177_s9] sm:$0xff] }
 0x116   : > { %v532_v4 = vsel %vm531_vm8, %v939_v63, %v940_v62  ;;  %v699_v62 = vunpack.c.h.b16 %v687_v56 }
 0x11b   : > { %v517_v9 = vpop.permute.xlu2 %516 }
 0x123   : > { %v943_v52 = vpop.permute.xlu0 %942  ;;  %v607_v22 = vpop.permute.xlu2 %606 }
 0x124   : > { %v923_v46 = vpop.permute.xlu1 %922  ;;  %v945_v58 = vunpack.i.h.bf16 %v943_v52  ;;  %v944_v59 = vunpack.i.l.bf16 %v943_v52 }
 0x125   : > { %v925_v47 = vunpack.i.h.bf16 %v923_v46  ;;  %v924_v48 = vunpack.i.l.bf16 %v923_v46 }
 0x126   : > { %v539_v3 = vsel %vm538_vm7, %v944_v59, %v945_v58 }
 0x127   : > { %v560_v49 = vsel %vm559_vm3, %v924_v48, %v925_v47  ;;  %v567_v6 = vpack.c.bf16 %v539_v3, %v532_v4  ;;  %vm796_vm3 = vcmask 458112  }
 0x128   : > { %v569_v51 = vpack.c.bf16 %v560_v49, %v560_v49 }
 0x12a   : > { %v581_v53 = vsel %vm579_vm4, %v569_v51, 0  ;;  %vm803_vm4 = vcmask 523712  }
 0x12b   : > { %586 = vmatpush.bf16.msra.mxu2 %v581_v53  ;;  %v514_v12 = vpop.permute.xlu0 %513 }
 0x12c   : > { %v928_v57 = vpop.permute.xlu1 %927  ;;  %v565_v13 = vpack.c.bf16 %v514_v12, %v1108_v36 }
 0x12d   : > { %v930_v60 = vunpack.i.h.bf16 %v928_v57  ;;  %v929_v61 = vunpack.i.l.bf16 %v928_v57 }
 0x12f   : > { %v546_v0 = vsel %vm545_vm5, %v929_v61, %v930_v60 }
 0x130   : > { %v568_v2 = vpack.c.bf16 %v553_v1, %v546_v0 }
 0x132   : > { %587 = vmatpush.bf16.msra.mxu2 %v568_v2 }
 0x133   : > { %v616_v18 = vpop.permute.xlu0 %615 }
 0x134   : > { %v948_v5 = vpop.permute.xlu1 %947 }
 0x135   : > { %v950_v7 = vunpack.i.h.bf16 %v948_v5  ;;  %v949_v8 = vunpack.i.l.bf16 %v948_v5  ;;  %v701_v5 = vpack.c.b16 %v699_v62, %v699_v62 }
 0x136   : > { %588 = vmatpush.bf16.msra.mxu2 %v567_v6 }
 0x137   : > { %v525_v10 = vsel %vm524_vm9, %v949_v8, %v950_v7  ;;  %v698_v7 = vunpack.c.l.b16 %v687_v56 }
 0x138   : > { %v566_v11 = vpack.c.bf16 %v525_v10, %v517_v9 }
 0x139   : > { %v700_v8 = vpack.c.b16 %v698_v7, %v698_v7 }
 0x13a   : > { %589 = vmatpush.bf16.msra.mxu2 %v566_v11 }
 0x13c   : > { %v602_v15 = vpop.permute.xlu1 %601 }
 0x13e   : > { %590 = vmatpush.bf16.msra.mxu2 %v565_v13 }
 0x141   : > { %887 = vmatmul.msk.bf16.vlgmr.msra.gmra.mxu2 %vm575_vm10, %v895_v14 }
 0x144   : > { %v621_v26 = vpop.permute.xlu1 %620 }
 0x1c4   : > { %v592_v16 = vpop.f32.mrf.mxu2 }
 0x1c5   : > { %v609_v17 = vmul.f32 %v602_v15, %v592_v16 }
 0x1c7   : > { %v623_v19 = vadd.f32 %v616_v18, %v609_v17 }
 0x1c9   : > { %v625_v21 = vmax.f32 %v623_v19, 0.0 }
 0x1cb   : > { %v630_v23 = vmul.f32 %v993_v20, %v625_v21 }
 0x1cc   : > { %v594_v24 = vpop.f32.mrf.mxu2 }
 0x1cd   : > { %633 = vst.msk [vmem:[#allocation3] sm:$0xff] %vm632_vm11, %v630_v23  ;;  %v610_v25 = vmul.f32 %v607_v22, %v594_v24 }
 0x1cf   : > { %v624_v27 = vadd.f32 %v621_v26, %v610_v25 }
 0x1d1   : > { %v626_v28 = vmax.f32 %v624_v27, 0.0 }
 0x1d3   : > { %v631_v29 = vmul.f32 %v993_v20, %v626_v28 }
 0x1d4   : > { %v635_v30 = vld [vmem:[#allocation3] sm:$0xff] }
 0x1d5   : > { %634 = vst.msk [vmem:[#allocation3 + $0x8] sm:$0xff] %vm632_vm11, %v631_v29 }
 0x1dc   : > { %v636_v31 = vld [vmem:[#allocation3 + $0x8] sm:$0xff] }
 0x1dd   : > { %v963_v32 = vpack.i.bf16 %v636_v31, %v635_v30  ;;  %v688_v33 = vpack.c.bf16 %v636_v31, %v635_v30 }
 0x1df   : > { %964 = vrot.lane.b32.xlu1 %v963_v32, %s1003_s17  ;;  %959 = vrot.lane.b32.xlu0 %v963_v32, %s1008_s24 }
 0x1e0   : > { %954 = vrot.lane.b32.xlu2 %v963_v32, %s1004_s18 }
 0x1e7   : > { %979 = vrot.lane.b32.xlu1 %v963_v32, %s1009_s27  ;;  %974 = vrot.lane.b32.xlu0 %v963_v32, %s1010_s28  ;;  %s1011_s27 = smov 113   ;;  %s1012_s28 = smov 115  }
 0x1e8   : > { %969 = vrot.lane.b32.xlu2 %v963_v32, %s1007_s23 }
 0x1ef   : > { %735 = vperm.xlu1 %951, %v732_v34   ;;  %989 = vrot.lane.b32.xlu0 %v963_v32, %s1005_s19 }
 0x1f0   : > { %984 = vrot.lane.b32.xlu2 %v963_v32, %s1006_s20 }
 0x1f8   : > { %742 = vperm.xlu2 %952, %v739_v35  }
 0x23a   : > { %v955_v36 = vpop.permute.xlu2 %954 }
 0x23b   : > { %v957_v37 = vunpack.i.h.bf16 %v955_v36  ;;  %v956_v38 = vunpack.i.l.bf16 %v955_v36 }
 0x23d   : > { %v695_v39 = vpack.c.bf16 %v957_v37, %v956_v38 }
 0x23f   : > { %706 = vmatpush.bf16.msra.mxu3 %v695_v39 }
 0x242   : > { %v970_v47 = vpop.permute.xlu2 %969 }
 0x243   : > { %v972_v48 = vunpack.i.h.bf16 %v970_v47  ;;  %v971_v49 = vunpack.i.l.bf16 %v970_v47 }
 0x245   : > { %v692_v54 = vpack.c.bf16 %v972_v48, %v971_v49 }
 0x24a   : > { %v985_v60 = vpop.permute.xlu2 %984 }
 0x24b   : > { %v987_v1 = vunpack.i.h.bf16 %v985_v60  ;;  %v986_v2 = vunpack.i.l.bf16 %v985_v60 }
 0x24d   : > { %v689_v6 = vpack.c.bf16 %v987_v1, %v986_v2 }
 0x251   : > { %v965_v40 = vpop.permute.xlu1 %964  ;;  %v960_v41 = vpop.permute.xlu0 %959 }
 0x252   : > { %v962_v42 = vunpack.i.h.bf16 %v960_v41  ;;  %v961_v43 = vunpack.i.l.bf16 %v960_v41  ;;  %v967_v44 = vunpack.i.h.bf16 %v965_v40  ;;  %v966_v45 = vunpack.i.l.bf16 %v965_v40  ;;  %v743_v15 = vpop.permute.xlu2 %742 }
 0x254   : > { %v694_v46 = vpack.c.bf16 %v962_v42, %v961_v43  ;;  %v693_v50 = vpack.c.bf16 %v967_v44, %v966_v45 }
 0x256   : > { %707 = vmatpush.bf16.msra.mxu3 %v694_v46 }
 0x259   : > { %v975_v51 = vpop.permute.xlu0 %974  ;;  %v980_v55 = vpop.permute.xlu1 %979 }
 0x25a   : > { %708 = vmatpush.bf16.msra.mxu3 %v693_v50  ;;  %v977_v52 = vunpack.i.h.bf16 %v975_v51  ;;  %v976_v53 = vunpack.i.l.bf16 %v975_v51  ;;  %v982_v57 = vunpack.i.h.bf16 %v980_v55  ;;  %v981_v58 = vunpack.i.l.bf16 %v980_v55 }
 0x25c   : > { %v691_v59 = vpack.c.bf16 %v977_v52, %v976_v53  ;;  %v690_v3 = vpack.c.bf16 %v982_v57, %v981_v58 }
 0x25e   : > { %709 = vmatpush.bf16.msra.mxu3 %v692_v54 }
 0x261   : > { %v990_v61 = vpop.permute.xlu0 %989  ;;  %v736_v13 = vpop.permute.xlu1 %735 }
 0x262   : > { %v992_v63 = vunpack.i.h.bf16 %v990_v61  ;;  %v991_v0 = vunpack.i.l.bf16 %v990_v61  ;;  %710 = vmatpush.bf16.msra.mxu3 %v691_v59 }
 0x264   : > { %v696_v4 = vpack.c.bf16 %v992_v63, %v991_v0 }
 0x266   : > { %711 = vmatpush.bf16.msra.mxu3 %v690_v3  ;;  %726 = vmatpush.bf16.msrb.mxu0 %v696_v4 }
 0x269   : > { %888 = vmatmul.msk.bf16.vlgmr.msrb.gmra.mxu0 %vm508_vm2, %v701_v5  ;;  %vm789_vm2 = vcmask 392512  }
 0x26a   : > { %712 = vmatpush.bf16.msra.mxu3 %v689_v6 }
 0x26e   : > { %713 = vmatpush.bf16.msra.mxu3 %v688_v33 }
 0x271   : > { %714 = vmatmul.bf16.vlgmr.msra.gmra.mxu3 %v700_v8 }
 0x2e6   : > { %v728_v9 = vpop.f32.mrf.mxu0 }
 0x2ee   : > { %v730_v10 = vpop.f32.mrf.mxu0 }
 0x2f4   : > { %v715_v11 = vpop.f32.mrf.mxu3 }
 0x2f5   : > { %v729_v12 = vadd.f32 %v728_v9, %v715_v11 }
 0x2f7   : > { %v738_v14 = vmul.f32 %v736_v13, %v729_v12 }
 0x2f9   : > { %v745_v16 = vadd.f32 %v743_v15, %v738_v14 }
 0x2fb   : > { %v746_v17 = vmax.f32 %v745_v16, 0.0 }
 0x2fc   : > { %v717_v18 = vpop.f32.mrf.mxu3 }
 0x2fd   : > { %748 = vst.msk [vmem:[#allocation4] sm:$0xff] %vm747_vm12, %v746_v17 }
 0x304   : > { %v763_v19 = vld [vmem:[#allocation4] sm:$0xff] }
 0x305   : > { %765 = vrot.lane.b32.xlu2 %v763_v19, %s1011_s27  ;;  %758 = vrot.lane.b32.xlu1 %v763_v19, %s1012_s28 }
 0x306   : > { %751 = vrot.lane.b32.xlu0 %v763_v19, %s1007_s23 }
 0x30d   : > { %786 = vrot.lane.b32.xlu2 %v763_v19, %s1004_s18  ;;  %779 = vrot.lane.b32.xlu1 %v763_v19, %s1013_s15 }
 0x30e   : > { %772 = vrot.lane.b32.xlu0 %v763_v19, %s1014_s16 }
 0x315   : > { %800 = vrot.lane.b32.xlu1 %v763_v19, %s1015_s25 }
 0x316   : > { %793 = vrot.lane.b32.xlu0 %v763_v19, %s1016_s26 }
 0x35f   : > { %v766_v21 = vpop.permute.xlu2 %765 }
 0x367   : > { %v787_v25 = vpop.permute.xlu2 %786 }
 0x377   : > { %v759_v20 = vpop.permute.xlu1 %758 }
 0x378   : > { %v752_v22 = vpop.permute.xlu0 %751 }
 0x379   : > { %755 = vst.msk [vmem:[%s411_s14] sm:$0xff] %vm754_vm13, %v752_v22 }
 0x37a   : > { %762 = vst.msk [vmem:[%s411_s14] sm:$0xff] %vm761_vm14, %v759_v20 }
 0x37b   : > { %769 = vst.msk [vmem:[%s411_s14] sm:$0xff] %vm768_vm15, %v766_v21 }
 0x37f   : > { %v780_v23 = vpop.permute.xlu1 %779 }
 0x380   : > { %v773_v24 = vpop.permute.xlu0 %772 }
 0x381   : > { %776 = vst.msk [vmem:[%s411_s14] sm:$0xff] %vm775_vm0, %v773_v24 }
 0x382   : > { %783 = vst.msk [vmem:[%s411_s14] sm:$0xff] %vm782_vm1, %v780_v23 }
 0x383   : > { %790 = vst.msk [vmem:[%s411_s14] sm:$0xff] %vm789_vm2, %v787_v25 }
 0x387   : > { %v801_v26 = vpop.permute.xlu1 %800 }
 0x388   : > { %v794_v27 = vpop.permute.xlu0 %793 }
 0x389   : > { %797 = vst.msk [vmem:[%s411_s14] sm:$0xff] %vm796_vm3, %v794_v27 }
 0x38a   : > { %804 = vst.msk [vmem:[%s411_s14] sm:$0xff] %vm803_vm4, %v801_v26 }
 0x38b PF: > { %s22_s21 = sadd.s32 1, %s1000_s21  }
 0x38c   : > { %p19_p4 = scmp.ge.s32.totalorder %s22_s21, 4  }
 0x38e   :  { %21 = sbr.rel (!%p19_p4) target bundleno = 1 (0x1), region = 98 }

</bundles_post_ra>
